<compile_context>
chip_gen: v7x
topology: tpu7x:2x2x1
jax: 0.10.0
libtpu: 0.0.40
codegen_flags: <defaults>
</compile_context>

<pallas_src>
import jax
import jax.numpy as jnp
from jax.experimental import pallas as pl
from jax.experimental.pallas import tpu as pltpu


# --------------------------------------------------------------------------- kernel
def _distance_kernel(xa_ref, xb_ref, w_ref, b_ref, dist_ref):
    eps = 1e-8  # torch.nn.functional.cosine_similarity default eps
    tb, S, H = xa_ref.shape

    # --- sentence encoder: mean-pool over sequence (explicit f32 accumulator) ---
    # Accumulating lane-dense (tb, H) slices keeps the bf16->f32 cast fused into the
    # vadds instead of materializing a (tb, S, H) f32 temporary.
    def mean_pool(x_ref):
        def body(s, acc):
            return acc + x_ref[:, s, :].astype(jnp.float32)
        acc0 = jnp.zeros((tb, H), jnp.float32)
        return jax.lax.fori_loop(0, S, body, acc0, unroll=min(8, S)) * (1.0 / S)

    pooled_a = mean_pool(xa_ref)                         # (tb, H) f32
    pooled_b = mean_pool(xb_ref)                         # (tb, H) f32

    # --- linear projection on the MXU (f32 accumulation) ---
    w = w_ref[...]
    bias = b_ref[...].astype(jnp.float32)                # (1, D)
    rep_a = jnp.dot(pooled_a.astype(w.dtype), w,
                    preferred_element_type=jnp.float32) + bias
    rep_b = jnp.dot(pooled_b.astype(w.dtype), w,
                    preferred_element_type=jnp.float32) + bias

    # --- cosine distance: 1 - <a,b> / max(||a||*||b||, eps) ---
    dot = jnp.sum(rep_a * rep_b, axis=-1)                # (tb,)
    na2 = jnp.sum(rep_a * rep_a, axis=-1)
    nb2 = jnp.sum(rep_b * rep_b, axis=-1)
    inv = jax.lax.rsqrt(jnp.maximum(na2 * nb2, eps * eps))   # EUP rsqrt
    d = 1.0 - dot * inv                                  # (tb,) f32

    if dist_ref.shape[0] == 1:
        dist_ref[...] = d.reshape(1, tb)                 # lane-dense row store
    else:
        dist_ref[...] = d.reshape(tb, 1)                 # column fallback


# ------------------------------------------------------------------------ tiling
def _round_up(x, m):
    return ((x + m - 1) // m) * m


def _default_vmem_limit():
    """Generation-aware VMEM budget: ~72% of physical per-TensorCore VMEM."""
    phys = None
    try:
        phys = getattr(pltpu.get_tpu_info(), "vmem_capacity_bytes", None)
    except Exception:
        phys = None
    if not phys:
        phys = 64 * 1024 * 1024      # conservative fallback = v7x per-TC VMEM
    return int(phys * 0.72)          # 128 MiB -> ~92 MiB, 64 MiB -> ~46 MiB


def _pick_batch_tile(B, S, H, D, in_itemsize, w_itemsize, vmem_limit):
    """Rows per grid step, sized against an explicit per-core VMEM budget."""
    # Streamed HBM bytes per batch row (xa + xb, one copy each).
    row_stream = 2 * S * H * in_itemsize
    # VMEM per row per step: double-buffered streamed tiles + f32 pooled_{a,b}
    # (4*H each) + f32 rep_{a,b} (4*D each) intermediates.
    per_row = 2 * row_stream + 8 * (H + D)
    # Fixed VMEM: W + bias (constant index_map, still allocated double-buffered by
    # the pipeline) + ~1 MiB slack for output blocks / compiler temporaries.
    fixed = 2 * (H * D * w_itemsize + D * 4) + (1 << 20)
    cap = max(1, (vmem_limit - fixed) // per_row)        # rows that fit

    # >=4 grid steps keeps the input stream double-buffered (DMA hidden behind
    # compute) and gives each v7x TensorCore >=2 steps -- but only when a step
    # still moves a DMA-efficient >=2 MiB of xa+xb.
    min_steps = 4 if B * row_stream >= 4 * (2 << 20) else 1
    steps = max(min_steps, pl.cdiv(B, cap))
    if steps > 1 and steps % 2:
        steps += 1                                       # balanced megacore split

    tb = pl.cdiv(B, steps)
    # Multiples of 128 keep the (1, tb) output store lane-dense (unmasked vst) when
    # there is more than one step; fall back to sublane multiples of 8 only when
    # VMEM cannot hold 128 rows.
    q = 128 if (steps > 1 and cap >= 128) else 8
    tb = min(_round_up(tb, q), max(q, (cap // q) * q))
    tb = min(tb, _round_up(B, 8))                        # never pad beyond one tile
    return max(8, tb)


# ----------------------------------------------------------------------- wrapper
def distance_embedder(xa, xb, w, b, *, vmem_limit_bytes=None):
    """1 - cosine_similarity(encode(xa), encode(xb)).  Returns shape (B,) float32."""
    B, S, H = xa.shape
    D = w.shape[1]
    assert xb.shape == (B, S, H) and w.shape == (H, D) and b.shape == (D,)

    if vmem_limit_bytes is None:
        vmem_limit_bytes = _default_vmem_limit()

    # Pad H / D to full lane width (128) so every vadd / MXU tile runs with full
    # lanes.  Zero padding is semantically neutral for pooling, the projection and
    # the cosine reduction.
    Hp, Dp = _round_up(H, 128), _round_up(D, 128)
    if Hp != H:
        xa = jnp.pad(xa, ((0, 0), (0, 0), (0, Hp - H)))
        xb = jnp.pad(xb, ((0, 0), (0, 0), (0, Hp - H)))
        w = jnp.pad(w, ((0, Hp - H), (0, 0)))
    if Dp != D:
        w = jnp.pad(w, ((0, 0), (0, Dp - D)))
        b = jnp.pad(b, (0, Dp - D))
    b2d = b.reshape(1, Dp).astype(jnp.float32)

    tb = _pick_batch_tile(B, S, Hp, Dp, xa.dtype.itemsize, w.dtype.itemsize,
                          vmem_limit_bytes)
    num_steps = pl.cdiv(B, tb)
    Bp = num_steps * tb
    if Bp != B:                                          # zero rows, sliced off below
        xa = jnp.pad(xa, ((0, Bp - B), (0, 0), (0, 0)))
        xb = jnp.pad(xb, ((0, Bp - B), (0, 0), (0, 0)))

    lane_dense = (num_steps == 1) or (tb % 128 == 0)
    if lane_dense:
        out_shape = jax.ShapeDtypeStruct((1, Bp), jnp.float32)
        out_spec = pl.BlockSpec((1, tb), lambda i: (0, i))
    else:
        out_shape = jax.ShapeDtypeStruct((Bp, 1), jnp.float32)
        out_spec = pl.BlockSpec((tb, 1), lambda i: (i, 0))

    dist = pl.pallas_call(
        _distance_kernel,
        out_shape=out_shape,
        grid=(num_steps,),
        in_specs=[
            pl.BlockSpec((tb, S, Hp), lambda i: (i, 0, 0)),   # stream xa tiles
            pl.BlockSpec((tb, S, Hp), lambda i: (i, 0, 0)),   # stream xb tiles
            pl.BlockSpec((Hp, Dp), lambda i: (0, 0)),         # W: VMEM-resident
            pl.BlockSpec((1, Dp), lambda i: (0, 0)),          # bias: VMEM-resident
        ],
        out_specs=out_spec,
        compiler_params=pltpu.CompilerParams(
            dimension_semantics=("parallel",),                # megacore split on v7x
            vmem_limit_bytes=int(vmem_limit_bytes),
        ),
    )(xa, xb, w, b2d)

    return dist[0, :B] if lane_dense else dist[:B, 0]


# --------------------------------------------------------------------- reference
def _reference(xa, xb, w, b):
    """Pure-JAX reference following the same dtype path as the kernel."""
    eps = 1e-8
    pa = jnp.mean(xa.astype(jnp.float32), axis=1)
    pb = jnp.mean(xb.astype(jnp.float32), axis=1)
    ra = jnp.dot(pa.astype(w.dtype), w,
                 preferred_element_type=jnp.float32) + b.astype(jnp.float32)
    rb = jnp.dot(pb.astype(w.dtype), w,
                 preferred_element_type=jnp.float32) + b.astype(jnp.float32)
    dot = jnp.sum(ra * rb, axis=-1)
    denom = jnp.maximum(
        jnp.sqrt(jnp.sum(ra * ra, axis=-1) * jnp.sum(rb * rb, axis=-1)), eps)
    return 1.0 - dot / denom


if __name__ == "__main__":
    B, S, H, D = 8, 8, 32, 32

    key = jax.random.PRNGKey(0)
    k_xa, k_xb, k_w, k_b = jax.random.split(key, 4)

    # sentence_features = [features_a, features_b]; bf16 in HBM halves streamed bytes.
    xa = jax.random.normal(k_xa, (B, S, H), dtype=jnp.float32).astype(jnp.bfloat16)
    xb = jax.random.normal(k_xb, (B, S, H), dtype=jnp.float32).astype(jnp.bfloat16)

    # deterministic synthetic encoder parameters (mean-pool + linear "model")
    w = (jax.random.normal(k_w, (H, D), dtype=jnp.float32)
         * (1.0 / jnp.sqrt(H))).astype(jnp.bfloat16)
    b = jax.random.normal(k_b, (D,), dtype=jnp.float32) * 0.01

    dist = jax.block_until_ready(distance_embedder(xa, xb, w, b))
    ref = _reference(xa, xb, w, b)

    assert dist.shape == (B,)
    assert jnp.allclose(dist, ref, atol=1e-4, rtol=1e-4), (dist, ref)

    print("KERNEL_OK")
</pallas_src>

<mosaic_0001>
module attributes {stable_mosaic.version = 11 : i64} {
  func.func @_distance_kernel(%arg0: i32, %arg1: memref<8x8x128xbf16, #tpu.memory_space<vmem>>, %arg2: memref<8x8x128xbf16, #tpu.memory_space<vmem>>, %arg3: memref<128x128xbf16, #tpu.memory_space<vmem>>, %arg4: memref<1x128xf32, #tpu.memory_space<vmem>>, %arg5: memref<1x8xf32, #tpu.memory_space<vmem>>) attributes {dimension_semantics = [#tpu.dimension_semantics<parallel>], iteration_bounds = array<i64: 1>, scalar_prefetch = 0 : i64, scratch_operands = 0 : i64, tpu.core_type = #tpu.core_type<tc>, window_params = [{transform_indices = @transform_0, window_bounds = array<i64: 8, 8, 128>}, {transform_indices = @transform_1, window_bounds = array<i64: 8, 8, 128>}, {pipeline_mode = #tpu.pipeline_mode<synchronous>, transform_indices = @transform_2, window_bounds = array<i64: 128, 128>}, {pipeline_mode = #tpu.pipeline_mode<synchronous>, transform_indices = @transform_3, window_bounds = array<i64: 1, 128>}, {transform_indices = @transform_4, window_bounds = array<i64: 1, 8>}]} {
    %cst = arith.constant 0.000000e+00 : f32
    %0 = vector.broadcast %cst : f32 to vector<8x128xf32>
    %c0_i32 = arith.constant 0 : i32
    %c0 = arith.constant 0 : index
    %1 = arith.index_cast %c0_i32 : i32 to index
    %c0_0 = arith.constant 0 : index
    %2 = vector.load %arg1[%c0, %1, %c0_0] : memref<8x8x128xbf16, #tpu.memory_space<vmem>>, vector<8x1x128xbf16>
    %3 = vector.shape_cast %2 : vector<8x1x128xbf16> to vector<8x128xbf16>
    %4 = arith.extf %3 : vector<8x128xbf16> to vector<8x128xf32>
    %5 = arith.addf %0, %4 : vector<8x128xf32>
    %c1_i32 = arith.constant 1 : i32
    %c0_1 = arith.constant 0 : index
    %6 = arith.index_cast %c1_i32 : i32 to index
    %c0_2 = arith.constant 0 : index
    %7 = vector.load %arg1[%c0_1, %6, %c0_2] : memref<8x8x128xbf16, #tpu.memory_space<vmem>>, vector<8x1x128xbf16>
    %8 = vector.shape_cast %7 : vector<8x1x128xbf16> to vector<8x128xbf16>
    %9 = arith.extf %8 : vector<8x128xbf16> to vector<8x128xf32>
    %10 = arith.addf %5, %9 : vector<8x128xf32>
    %c2_i32 = arith.constant 2 : i32
    %c0_3 = arith.constant 0 : index
    %11 = arith.index_cast %c2_i32 : i32 to index
    %c0_4 = arith.constant 0 : index
    %12 = vector.load %arg1[%c0_3, %11, %c0_4] : memref<8x8x128xbf16, #tpu.memory_space<vmem>>, vector<8x1x128xbf16>
    %13 = vector.shape_cast %12 : vector<8x1x128xbf16> to vector<8x128xbf16>
    %14 = arith.extf %13 : vector<8x128xbf16> to vector<8x128xf32>
    %15 = arith.addf %10, %14 : vector<8x128xf32>
    %c3_i32 = arith.constant 3 : i32
    %c0_5 = arith.constant 0 : index
    %16 = arith.index_cast %c3_i32 : i32 to index
    %c0_6 = arith.constant 0 : index
    %17 = vector.load %arg1[%c0_5, %16, %c0_6] : memref<8x8x128xbf16, #tpu.memory_space<vmem>>, vector<8x1x128xbf16>
    %18 = vector.shape_cast %17 : vector<8x1x128xbf16> to vector<8x128xbf16>
    %19 = arith.extf %18 : vector<8x128xbf16> to vector<8x128xf32>
    %20 = arith.addf %15, %19 : vector<8x128xf32>
    %c4_i32 = arith.constant 4 : i32
    %c0_7 = arith.constant 0 : index
    %21 = arith.index_cast %c4_i32 : i32 to index
    %c0_8 = arith.constant 0 : index
    %22 = vector.load %arg1[%c0_7, %21, %c0_8] : memref<8x8x128xbf16, #tpu.memory_space<vmem>>, vector<8x1x128xbf16>
    %23 = vector.shape_cast %22 : vector<8x1x128xbf16> to vector<8x128xbf16>
    %24 = arith.extf %23 : vector<8x128xbf16> to vector<8x128xf32>
    %25 = arith.addf %20, %24 : vector<8x128xf32>
    %c5_i32 = arith.constant 5 : i32
    %c0_9 = arith.constant 0 : index
    %26 = arith.index_cast %c5_i32 : i32 to index
    %c0_10 = arith.constant 0 : index
    %27 = vector.load %arg1[%c0_9, %26, %c0_10] : memref<8x8x128xbf16, #tpu.memory_space<vmem>>, vector<8x1x128xbf16>
    %28 = vector.shape_cast %27 : vector<8x1x128xbf16> to vector<8x128xbf16>
    %29 = arith.extf %28 : vector<8x128xbf16> to vector<8x128xf32>
    %30 = arith.addf %25, %29 : vector<8x128xf32>
    %c6_i32 = arith.constant 6 : i32
    %c0_11 = arith.constant 0 : index
    %31 = arith.index_cast %c6_i32 : i32 to index
    %c0_12 = arith.constant 0 : index
    %32 = vector.load %arg1[%c0_11, %31, %c0_12] : memref<8x8x128xbf16, #tpu.memory_space<vmem>>, vector<8x1x128xbf16>
    %33 = vector.shape_cast %32 : vector<8x1x128xbf16> to vector<8x128xbf16>
    %34 = arith.extf %33 : vector<8x128xbf16> to vector<8x128xf32>
    %35 = arith.addf %30, %34 : vector<8x128xf32>
    %c7_i32 = arith.constant 7 : i32
    %c0_13 = arith.constant 0 : index
    %36 = arith.index_cast %c7_i32 : i32 to index
    %c0_14 = arith.constant 0 : index
    %37 = vector.load %arg1[%c0_13, %36, %c0_14] : memref<8x8x128xbf16, #tpu.memory_space<vmem>>, vector<8x1x128xbf16>
    %38 = vector.shape_cast %37 : vector<8x1x128xbf16> to vector<8x128xbf16>
    %39 = arith.extf %38 : vector<8x128xbf16> to vector<8x128xf32>
    %40 = arith.addf %35, %39 : vector<8x128xf32>
    %c8_i32 = arith.constant 8 : i32
    %cst_15 = arith.constant 1.250000e-01 : f32
    %41 = vector.broadcast %cst_15 : f32 to vector<8x128xf32>
    %42 = arith.mulf %40, %41 : vector<8x128xf32>
    %cst_16 = arith.constant 0.000000e+00 : f32
    %43 = vector.broadcast %cst_16 : f32 to vector<8x128xf32>
    %c0_i32_17 = arith.constant 0 : i32
    %c0_18 = arith.constant 0 : index
    %44 = arith.index_cast %c0_i32_17 : i32 to index
    %c0_19 = arith.constant 0 : index
    %45 = vector.load %arg2[%c0_18, %44, %c0_19] : memref<8x8x128xbf16, #tpu.memory_space<vmem>>, vector<8x1x128xbf16>
    %46 = vector.shape_cast %45 : vector<8x1x128xbf16> to vector<8x128xbf16>
    %47 = arith.extf %46 : vector<8x128xbf16> to vector<8x128xf32>
    %48 = arith.addf %43, %47 : vector<8x128xf32>
    %c1_i32_20 = arith.constant 1 : i32
    %c0_21 = arith.constant 0 : index
    %49 = arith.index_cast %c1_i32_20 : i32 to index
    %c0_22 = arith.constant 0 : index
    %50 = vector.load %arg2[%c0_21, %49, %c0_22] : memref<8x8x128xbf16, #tpu.memory_space<vmem>>, vector<8x1x128xbf16>
    %51 = vector.shape_cast %50 : vector<8x1x128xbf16> to vector<8x128xbf16>
    %52 = arith.extf %51 : vector<8x128xbf16> to vector<8x128xf32>
    %53 = arith.addf %48, %52 : vector<8x128xf32>
    %c2_i32_23 = arith.constant 2 : i32
    %c0_24 = arith.constant 0 : index
    %54 = arith.index_cast %c2_i32_23 : i32 to index
    %c0_25 = arith.constant 0 : index
    %55 = vector.load %arg2[%c0_24, %54, %c0_25] : memref<8x8x128xbf16, #tpu.memory_space<vmem>>, vector<8x1x128xbf16>
    %56 = vector.shape_cast %55 : vector<8x1x128xbf16> to vector<8x128xbf16>
    %57 = arith.extf %56 : vector<8x128xbf16> to vector<8x128xf32>
    %58 = arith.addf %53, %57 : vector<8x128xf32>
    %c3_i32_26 = arith.constant 3 : i32
    %c0_27 = arith.constant 0 : index
    %59 = arith.index_cast %c3_i32_26 : i32 to index
    %c0_28 = arith.constant 0 : index
    %60 = vector.load %arg2[%c0_27, %59, %c0_28] : memref<8x8x128xbf16, #tpu.memory_space<vmem>>, vector<8x1x128xbf16>
    %61 = vector.shape_cast %60 : vector<8x1x128xbf16> to vector<8x128xbf16>
    %62 = arith.extf %61 : vector<8x128xbf16> to vector<8x128xf32>
    %63 = arith.addf %58, %62 : vector<8x128xf32>
    %c4_i32_29 = arith.constant 4 : i32
    %c0_30 = arith.constant 0 : index
    %64 = arith.index_cast %c4_i32_29 : i32 to index
    %c0_31 = arith.constant 0 : index
    %65 = vector.load %arg2[%c0_30, %64, %c0_31] : memref<8x8x128xbf16, #tpu.memory_space<vmem>>, vector<8x1x128xbf16>
    %66 = vector.shape_cast %65 : vector<8x1x128xbf16> to vector<8x128xbf16>
    %67 = arith.extf %66 : vector<8x128xbf16> to vector<8x128xf32>
    %68 = arith.addf %63, %67 : vector<8x128xf32>
    %c5_i32_32 = arith.constant 5 : i32
    %c0_33 = arith.constant 0 : index
    %69 = arith.index_cast %c5_i32_32 : i32 to index
    %c0_34 = arith.constant 0 : index
    %70 = vector.load %arg2[%c0_33, %69, %c0_34] : memref<8x8x128xbf16, #tpu.memory_space<vmem>>, vector<8x1x128xbf16>
    %71 = vector.shape_cast %70 : vector<8x1x128xbf16> to vector<8x128xbf16>
    %72 = arith.extf %71 : vector<8x128xbf16> to vector<8x128xf32>
    %73 = arith.addf %68, %72 : vector<8x128xf32>
    %c6_i32_35 = arith.constant 6 : i32
    %c0_36 = arith.constant 0 : index
    %74 = arith.index_cast %c6_i32_35 : i32 to index
    %c0_37 = arith.constant 0 : index
    %75 = vector.load %arg2[%c0_36, %74, %c0_37] : memref<8x8x128xbf16, #tpu.memory_space<vmem>>, vector<8x1x128xbf16>
    %76 = vector.shape_cast %75 : vector<8x1x128xbf16> to vector<8x128xbf16>
    %77 = arith.extf %76 : vector<8x128xbf16> to vector<8x128xf32>
    %78 = arith.addf %73, %77 : vector<8x128xf32>
    %c7_i32_38 = arith.constant 7 : i32
    %c0_39 = arith.constant 0 : index
    %79 = arith.index_cast %c7_i32_38 : i32 to index
    %c0_40 = arith.constant 0 : index
    %80 = vector.load %arg2[%c0_39, %79, %c0_40] : memref<8x8x128xbf16, #tpu.memory_space<vmem>>, vector<8x1x128xbf16>
    %81 = vector.shape_cast %80 : vector<8x1x128xbf16> to vector<8x128xbf16>
    %82 = arith.extf %81 : vector<8x128xbf16> to vector<8x128xf32>
    %83 = arith.addf %78, %82 : vector<8x128xf32>
    %c8_i32_41 = arith.constant 8 : i32
    %cst_42 = arith.constant 1.250000e-01 : f32
    %84 = vector.broadcast %cst_42 : f32 to vector<8x128xf32>
    %85 = arith.mulf %83, %84 : vector<8x128xf32>
    %c0_43 = arith.constant 0 : index
    %c0_44 = arith.constant 0 : index
    %86 = vector.load %arg3[%c0_43, %c0_44] : memref<128x128xbf16, #tpu.memory_space<vmem>>, vector<128x128xbf16>
    %c0_45 = arith.constant 0 : index
    %c0_46 = arith.constant 0 : index
    %87 = vector.load %arg4[%c0_45, %c0_46] : memref<1x128xf32, #tpu.memory_space<vmem>>, vector<1x128xf32>
    %88 = arith.truncf %42 : vector<8x128xf32> to vector<8x128xbf16>
    %cst_47 = arith.constant dense<0.000000e+00> : vector<8x128xf32>
    %89 = tpu.matmul %88, %86, %cst_47 {dimension_numbers = #tpu.dot_dimension_numbers<[1], [0], [0], [1], [0, 0, 1, 1], [], []>} : vector<8x128xbf16>, vector<128x128xbf16>, vector<8x128xf32> -> vector<8x128xf32>
    %90 = vector.broadcast %87 : vector<1x128xf32> to vector<8x128xf32>
    %91 = arith.addf %89, %90 : vector<8x128xf32>
    %92 = arith.truncf %85 : vector<8x128xf32> to vector<8x128xbf16>
    %cst_48 = arith.constant dense<0.000000e+00> : vector<8x128xf32>
    %93 = tpu.matmul %92, %86, %cst_48 {dimension_numbers = #tpu.dot_dimension_numbers<[1], [0], [0], [1], [0, 0, 1, 1], [], []>} : vector<8x128xbf16>, vector<128x128xbf16>, vector<8x128xf32> -> vector<8x128xf32>
    %94 = vector.broadcast %87 : vector<1x128xf32> to vector<8x128xf32>
    %95 = arith.addf %93, %94 : vector<8x128xf32>
    %96 = arith.mulf %91, %95 : vector<8x128xf32>
    %cst_49 = arith.constant dense<0.000000e+00> : vector<8xf32>
    %97 = vector.multi_reduction <add>, %96, %cst_49 [1] : vector<8x128xf32> to vector<8xf32>
    %98 = arith.mulf %91, %91 : vector<8x128xf32>
    %cst_50 = arith.constant dense<0.000000e+00> : vector<8xf32>
    %99 = vector.multi_reduction <add>, %98, %cst_50 [1] : vector<8x128xf32> to vector<8xf32>
    %100 = arith.mulf %95, %95 : vector<8x128xf32>
    %cst_51 = arith.constant dense<0.000000e+00> : vector<8xf32>
    %101 = vector.multi_reduction <add>, %100, %cst_51 [1] : vector<8x128xf32> to vector<8xf32>
    %102 = arith.mulf %99, %101 : vector<8xf32>
    %cst_52 = arith.constant 1.000000e-16 : f32
    %103 = vector.broadcast %cst_52 : f32 to vector<8xf32>
    %104 = arith.maximumf %102, %103 : vector<8xf32>
    %105 = math.rsqrt %104 : vector<8xf32>
    %106 = arith.mulf %97, %105 : vector<8xf32>
    %cst_53 = arith.constant 1.000000e+00 : f32
    %107 = vector.broadcast %cst_53 : f32 to vector<8xf32>
    %108 = arith.subf %107, %106 : vector<8xf32>
    %109 = vector.shape_cast %108 : vector<8xf32> to vector<1x8xf32>
    %c0_54 = arith.constant 0 : index
    %c0_55 = arith.constant 0 : index
    %110 = vector.load %arg5[%c0_54, %c0_55] : memref<1x8xf32, #tpu.memory_space<vmem>>, vector<1x8xf32>
    tpu.vector_store %arg5[%c0_54, %c0_55], %109 {strides = array<i32>} : memref<1x8xf32, #tpu.memory_space<vmem>>, vector<1x8xf32>,
    return
  }
  func.func @transform_0(%arg0: i32) -> (i32, i32, i32) {
    %c0_i32 = arith.constant 0 : i32
    %c0_i32_0 = arith.constant 0 : i32
    %c0_i32_1 = arith.constant 0 : i32
    return %arg0, %c0_i32, %c0_i32_0 : i32, i32, i32
  }
  func.func @transform_1(%arg0: i32) -> (i32, i32, i32) {
    %c0_i32 = arith.constant 0 : i32
    %c0_i32_0 = arith.constant 0 : i32
    %c0_i32_1 = arith.constant 0 : i32
    return %arg0, %c0_i32, %c0_i32_0 : i32, i32, i32
  }
  func.func @transform_2(%arg0: i32) -> (i32, i32) {
    %c0_i32 = arith.constant 0 : i32
    %c0_i32_0 = arith.constant 0 : i32
    %c0_i32_1 = arith.constant 0 : i32
    return %c0_i32, %c0_i32_0 : i32, i32
  }
  func.func @transform_3(%arg0: i32) -> (i32, i32) {
    %c0_i32 = arith.constant 0 : i32
    %c0_i32_0 = arith.constant 0 : i32
    %c0_i32_1 = arith.constant 0 : i32
    return %c0_i32, %c0_i32_0 : i32, i32
  }
  func.func @transform_4(%arg0: i32) -> (i32, i32) {
    %c0_i32 = arith.constant 0 : i32
    %c0_i32_0 = arith.constant 0 : i32
    return %c0_i32, %arg0 : i32, i32
  }
}

</mosaic_0001>

<bundles_post_ra>
// kernel: tpu_custom_call.1
= control target key start
LH: loop header
LB: loop body
LE: loop exit
PB: predicated region body
PF: predicated region fallthrough
CT: control target
= control target key end

     0   :  { %9 = vsyncpa [#allocation3], 0  ;;  %s1212_s0 = inlined_call_operand.hbm [shape: bf16[8,8,128], index: 0, kind: input, shape index: {}]   ;;  %s1213_s1 = inlined_call_operand.hbm [shape: bf16[8,8,128], index: 1, kind: input, shape index: {}]   ;;  %s1214_s2 = inlined_call_operand.hbm [shape: bf16[128,128], index: 2, kind: input, shape index: {}]   ;;  %s1215_s3 = inlined_call_operand.vmem [shape: f32[1,128], index: 3, kind: input, shape index: {}]   ;;  %s1216_s4 = inlined_call_operand.hbm [shape: f32[1,8], index: 4, kind: output, shape index: {}]  }
   0x1   :  { %10 = vsyncpa [#allocation6], 0 }
   0x2   :  { %11 = vsyncpa [#allocation4], 0  ;;  %s1077_s15 = smov [#allocation5]   ;;  %s1078_s17 = smov [#allocation2]  }
   0x3   :  { %s29_s16 = sshll.u32 %s1077_s15, 4  ;;  %s17_s18 = sshll.u32 %s1078_s17, 4  ;;  %s30_s16 = int_to_ptr.vmem [resolvable:$true] %s29_s16  ;;  %s1110_s18 = int_to_ptr.vmem [resolvable:$true] %s17_s18 }
   0x4   :  { %s983_s21 = scalar_lea.hbm %s1213_s1, 512 }
   0x5   :  { %p984_p0 = scmp.ne.s32.totalorder %s1213_s1, %s983_s21  ;;  %p987_p1 = scmp.lt.u32.totalorder %s983_s21, %s1213_s1 }
   0x7   :  { %p989_p2 = pnand %p987_p1, %p984_p0 }
   0x9   :  { %992 = shalt.err (!%p989_p2)
}
   0xa   :  { %s993_s26 = scalar_lea.vmem %s30_s16, 512  ;;  %p998_p4 = scmp.lt.s32.totalorder %s30_s16, %s30_s16 }
   0xb   :  { %p994_p3 = scmp.ne.s32.totalorder %s30_s16, %s993_s26  ;;  %p999_p5 = scmp.lt.s32.totalorder %s993_s26, %s993_s26 }
   0xd   :  { %p1000_p6 = por %p999_p5, %p998_p4 }
   0xf   :  { %p1001_p7 = pnand %p1000_p6, %p994_p3 }
  0x11   :  { %1004 = shalt.err (!%p1001_p7)
}
  0x12   :  { %s1079_s27 = smov 64   ;;  %s1080_s28 = smov 4  }
  0x13   :  { %35 = dma.hbm_to_vmem [thread:$0]  %s1213_s1, 512, %s30_s16, [#allocation6], %s1079_s27, %s1079_s27, %s1080_s28  }
  0x14   :  { %s1005_s7 = scalar_lea.hbm %s1212_s0, 512 }
  0x15   :  { %p1006_p8 = scmp.ne.s32.totalorder %s1212_s0, %s1005_s7  ;;  %p1009_p9 = scmp.lt.u32.totalorder %s1005_s7, %s1212_s0 }
  0x17   :  { %p1011_p10 = pnand %p1009_p9, %p1006_p8 }
  0x19   :  { %1014 = shalt.err (!%p1011_p10)
}
  0x1a   :  { %s1015_s12 = scalar_lea.vmem %s1110_s18, 512  ;;  %p1020_p12 = scmp.lt.s32.totalorder %s1110_s18, %s1110_s18 }
  0x1b   :  { %p1016_p11 = scmp.ne.s32.totalorder %s1110_s18, %s1015_s12  ;;  %p1021_p13 = scmp.lt.s32.totalorder %s1015_s12, %s1015_s12 }
  0x1d   :  { %p1022_p0 = por %p1021_p13, %p1020_p12 }
  0x1f   :  { %p1023_p1 = pnand %p1022_p0, %p1016_p11 }
  0x21   :  { %1026 = shalt.err (!%p1023_p1)
}
  0x22   :  { %23 = dma.hbm_to_vmem [thread:$0]  %s1212_s0, 512, %s1110_s18, [#allocation3], %s1079_s27, %s1079_s27, %s1080_s28  }
  0x23   :  { %s1081_s14 = smov [#allocation7]   ;;  %s1027_s19 = scalar_lea.hbm %s1214_s2, 1024 }
  0x24   :  { %s41_s15 = sshll.u32 %s1081_s14, 4  ;;  %p1028_p2 = scmp.ne.s32.totalorder %s1214_s2, %s1027_s19  ;;  %s42_s15 = int_to_ptr.vmem [resolvable:$true] %s41_s15 }
  0x25   :  { %p1031_p3 = scmp.lt.u32.totalorder %s1027_s19, %s1214_s2 }
  0x27   :  { %p1033_p4 = pnand %p1031_p3, %p1028_p2 }
  0x29   :  { %1036 = shalt.err (!%p1033_p4)
}
  0x2a   :  { %s1037_s24 = scalar_lea.vmem %s42_s15, 1024  ;;  %p1042_p6 = scmp.lt.s32.totalorder %s42_s15, %s42_s15 }
  0x2b   :  { %p1038_p5 = scmp.ne.s32.totalorder %s42_s15, %s1037_s24  ;;  %p1043_p7 = scmp.lt.s32.totalorder %s1037_s24, %s1037_s24 }
  0x2d   :  { %p1044_p8 = por %p1043_p7, %p1042_p6 }
  0x2f   :  { %p1045_p9 = pnand %p1044_p8, %p1038_p5 }
  0x31   :  { %1048 = shalt.err (!%p1045_p9)
}
  0x32   :  { %47 = dma.hbm_to_vmem [thread:$0]  %s1214_s2, 1024, %s42_s15, [#allocation6], %s1079_s27, %s1079_s27, %s1080_s28  }
  0x33   :  { %1071 = dma.done.wait [#allocation3], 512  }
  0x34   :  { %1072 = vsyncadd [#allocation3], 4294966784 }
  0x35   :  { %1073 = dma.done.wait [#allocation6], 1536  }
  0x36   :  { %1074 = vsyncadd [#allocation6], 4294965760  ;;  %v1082_v0 = vmov 0.0   ;;  %vm1083_vm0 = vmmov 0   ;;  %v973_v1 = vld [vmem:[#allocation7] sm:$0xff]   ;;  %v974_v2 = vld [vmem:[#allocation7 + $0x8] sm:$0xff]  }
  0x37   :  { %925 = vmatprep.subr.bf16.mxu0 %v1082_v0  ;;  %945 = vmatprep.subr.bf16.mxu1 %v1082_v0  ;;  %v975_v3 = vld [vmem:[#allocation7 + $0x10] sm:$0xff]   ;;  %v976_v4 = vld [vmem:[#allocation7 + $0x18] sm:$0xff]   ;;  %v60_v5 = vld [vmem:[#allocation2] sm:$0x1]  ;;  %vm668_vm1 = vcmask 1041409   ;;  %vm671_vm2 = vcmask 1042434  }
  0x38   :  { %941 = vmatprep.mubr.msk.bf16.mxu0 %vm1083_vm0, %v1082_v0  ;;  %961 = vmatprep.mubr.msk.bf16.mxu1 %vm1083_vm0, %v1082_v0  ;;  %v61_v6 = vld [vmem:[#allocation2 + $0x4] sm:$0x1]  ;;  %v62_v7 = vld [vmem:[#allocation2 + $0x8] sm:$0x1]  ;;  %v63_v8 = vld [vmem:[#allocation2 + $0xc] sm:$0x1]  ;;  %v68_v11 = vunpack.c.l.bf16 %v60_v5 }
  0x39   :  { %926 = vmatpush3.bf16.msra.mxu0 %v973_v1  ;;  %946 = vmatpush3.bf16.msra.mxu1 %v973_v1  ;;  %v64_v9 = vld [vmem:[#allocation2 + $0x10] sm:$0x1]  ;;  %v65_v10 = vld [vmem:[#allocation2 + $0x14] sm:$0x1]  ;;  %v69_v12 = vunpack.c.l.bf16 %v61_v6  ;;  %v70_v13 = vunpack.c.l.bf16 %v62_v7  ;;  %v66_v14 = vld [vmem:[#allocation2 + $0x18] sm:$0x1]  ;;  %v71_v16 = vunpack.c.l.bf16 %v63_v8 }
  0x3a   :  { %927 = vmatprep.subr.bf16.mxu0 %v1082_v0  ;;  %947 = vmatprep.subr.bf16.mxu1 %v1082_v0  ;;  %v67_v15 = vld [vmem:[#allocation2 + $0x1c] sm:$0x1]  ;;  %v72_v17 = vunpack.c.l.bf16 %v64_v9  ;;  %v73_v18 = vunpack.c.l.bf16 %v65_v10  ;;  %v1170_v19 = vld [vmem:[#allocation2] sm:$0x2]  ;;  %v74_v20 = vunpack.c.l.bf16 %v66_v14  ;;  %v92_v22 = vrot.slane %v68_v11, 1  ;;  %v978_v56 = vld [vmem:[#allocation7 + $0x28] sm:$0xff]  }
  0x3b   :  { %v75_v21 = vunpack.c.l.bf16 %v67_v15  ;;  %v93_v23 = vrot.slane %v69_v12, 1  ;;  %v117_v24 = vld [vmem:[#allocation2 + $0x4] sm:$0x2]  ;;  %v118_v25 = vld [vmem:[#allocation2 + $0x8] sm:$0x2]  ;;  %v94_v26 = vrot.slane %v70_v13, 1  ;;  %v124_v43 = vunpack.c.l.bf16 %v1170_v19 }
  0x3c   :  { %v95_v27 = vrot.slane %v71_v16, 1  ;;  %v96_v28 = vrot.slane %v72_v17, 1  ;;  %v97_v29 = vrot.slane %v73_v18, 1  ;;  %v119_v30 = vld [vmem:[#allocation2 + $0xc] sm:$0x2]  ;;  %v98_v31 = vrot.slane %v74_v20, 1 }
  0x3d   :  { %928 = vmatpush3.bf16.msra.mxu0 %v974_v2  ;;  %948 = vmatpush3.bf16.msra.mxu1 %v974_v2  ;;  %v99_v32 = vrot.slane %v75_v21, 1  ;;  %v108_v33 = vadd.f32 %v92_v22, %v68_v11  ;;  %v109_v34 = vadd.f32 %v93_v23, %v69_v12  ;;  %v120_v35 = vld [vmem:[#allocation2 + $0x10] sm:$0x2]  ;;  %v121_v36 = vld [vmem:[#allocation2 + $0x14] sm:$0x2]  ;;  %v977_v37 = vld [vmem:[#allocation7 + $0x20] sm:$0xff]   ;;  %v110_v38 = vadd.f32 %v94_v26, %v70_v13 }
  0x3e   :  { %929 = vmatprep.subr.bf16.mxu0 %v1082_v0  ;;  %949 = vmatprep.subr.bf16.mxu1 %v1082_v0  ;;  %v111_v39 = vadd.f32 %v95_v27, %v71_v16  ;;  %v112_v40 = vadd.f32 %v96_v28, %v72_v17  ;;  %v122_v41 = vld [vmem:[#allocation2 + $0x18] sm:$0x2]  ;;  %v123_v42 = vld [vmem:[#allocation2 + $0x1c] sm:$0x2]  ;;  %v113_v44 = vadd.f32 %v97_v29, %v73_v18  ;;  %v125_v47 = vunpack.c.l.bf16 %v117_v24  ;;  %v979_v2 = vld [vmem:[#allocation7 + $0x30] sm:$0xff]  }
  0x3f   :  { %v114_v45 = vadd.f32 %v98_v31, %v74_v20  ;;  %v115_v46 = vadd.f32 %v99_v32, %v75_v21  ;;  %v126_v48 = vunpack.c.l.bf16 %v118_v25  ;;  %v127_v49 = vunpack.c.l.bf16 %v119_v30  ;;  %v188_v7 = vld [vmem:[#allocation2] sm:$0x4]  ;;  %v189_v12 = vld [vmem:[#allocation2 + $0x4] sm:$0x4]  ;;  %v190_v13 = vld [vmem:[#allocation2 + $0x8] sm:$0x4] }
  0x40   :  { %v128_v50 = vunpack.c.l.bf16 %v120_v35  ;;  %v129_v51 = vunpack.c.l.bf16 %v121_v36  ;;  %v130_v52 = vunpack.c.l.bf16 %v122_v41  ;;  %v131_v53 = vunpack.c.l.bf16 %v123_v42  ;;  %v191_v18 = vld [vmem:[#allocation2 + $0xc] sm:$0x4]  ;;  %v192_v23 = vld [vmem:[#allocation2 + $0x10] sm:$0x4]  ;;  %v193_v24 = vld [vmem:[#allocation2 + $0x14] sm:$0x4] }
  0x41   :  { %930 = vmatpush3.bf16.msra.mxu0 %v975_v3  ;;  %950 = vmatpush3.bf16.msra.mxu1 %v975_v3  ;;  %v140_v54 = vrot.slane %v124_v43, 2  ;;  %v141_v55 = vrot.slane %v125_v47, 2  ;;  %v142_v57 = vrot.slane %v126_v48, 2  ;;  %v143_v58 = vrot.slane %v127_v49, 2  ;;  %v194_v29 = vld [vmem:[#allocation2 + $0x18] sm:$0x4] }
  0x42   :  { %931 = vmatprep.subr.bf16.mxu0 %v1082_v0  ;;  %951 = vmatprep.subr.bf16.mxu1 %v1082_v0  ;;  %v144_v59 = vrot.slane %v128_v50, 2  ;;  %v145_v60 = vrot.slane %v129_v51, 2  ;;  %v146_v61 = vrot.slane %v130_v52, 2  ;;  %v147_v62 = vrot.slane %v131_v53, 2  ;;  %v195_v30 = vld [vmem:[#allocation2 + $0x1c] sm:$0x4] }
  0x43   :  { %v156_v63 = vadd.f32 %v140_v54, %v108_v33  ;;  %v157_v1 = vadd.f32 %v141_v55, %v109_v34  ;;  %v158_v3 = vadd.f32 %v142_v57, %v110_v38  ;;  %v164_v10 = vrot.slane %v124_v43, 3  ;;  %v980_v35 = vld [vmem:[#allocation7 + $0x38] sm:$0xff]  }
  0x44   :  { %v160_v5 = vadd.f32 %v144_v59, %v112_v40  ;;  %v161_v6 = vadd.f32 %v145_v60, %v113_v44  ;;  %v162_v8 = vadd.f32 %v146_v61, %v114_v45  ;;  %v163_v9 = vadd.f32 %v147_v62, %v115_v46  ;;  %v261_v60 = vld [vmem:[#allocation2 + $0x4] sm:$0x8]  ;;  %v262_v61 = vld [vmem:[#allocation2 + $0x8] sm:$0x8] }
  0x45   :  { %932 = vmatpush3.bf16.msra.mxu0 %v976_v4  ;;  %952 = vmatpush3.bf16.msra.mxu1 %v976_v4  ;;  %v159_v4 = vadd.f32 %v143_v58, %v111_v39  ;;  %v165_v11 = vrot.slane %v125_v47, 3  ;;  %v166_v14 = vrot.slane %v126_v48, 3  ;;  %v167_v15 = vrot.slane %v127_v49, 3 }
  0x46   :  { %933 = vmatprep.subr.bf16.mxu0 %v1082_v0  ;;  %953 = vmatprep.subr.bf16.mxu1 %v1082_v0  ;;  %v168_v16 = vrot.slane %v128_v50, 3  ;;  %v169_v17 = vrot.slane %v129_v51, 3  ;;  %v170_v19 = vrot.slane %v130_v52, 3  ;;  %v171_v20 = vrot.slane %v131_v53, 3 }
  0x47   :  { %v180_v21 = vadd.f32 %v164_v10, %v156_v63  ;;  %v181_v22 = vadd.f32 %v165_v11, %v157_v1  ;;  %v182_v25 = vadd.f32 %v166_v14, %v158_v3  ;;  %v183_v26 = vadd.f32 %v167_v15, %v159_v4  ;;  %v263_v3 = vld [vmem:[#allocation2 + $0xc] sm:$0x8]  ;;  %v266_v14 = vld [vmem:[#allocation2 + $0x18] sm:$0x8]  ;;  %v267_v15 = vld [vmem:[#allocation2 + $0x1c] sm:$0x8] }
  0x48   :  { %v184_v27 = vadd.f32 %v168_v16, %v160_v5  ;;  %v185_v28 = vadd.f32 %v169_v17, %v161_v6  ;;  %v186_v31 = vadd.f32 %v170_v19, %v162_v8  ;;  %v187_v32 = vadd.f32 %v171_v20, %v163_v9  ;;  %v264_v8 = vld [vmem:[#allocation2 + $0x10] sm:$0x8]  ;;  %v265_v9 = vld [vmem:[#allocation2 + $0x14] sm:$0x8] }
  0x49   :  { %934 = vmatpush3.bf16.msra.mxu0 %v977_v37  ;;  %954 = vmatpush3.bf16.msra.mxu1 %v977_v37  ;;  %v196_v33 = vunpack.c.l.bf16 %v188_v7  ;;  %v197_v34 = vunpack.c.l.bf16 %v189_v12  ;;  %v198_v36 = vunpack.c.l.bf16 %v190_v13  ;;  %v199_v37 = vunpack.c.l.bf16 %v191_v18 }
  0x4a   :  { %935 = vmatprep.subr.bf16.mxu0 %v1082_v0  ;;  %955 = vmatprep.subr.bf16.mxu1 %v1082_v0  ;;  %v200_v38 = vunpack.c.l.bf16 %v192_v23  ;;  %v201_v39 = vunpack.c.l.bf16 %v193_v24  ;;  %v202_v40 = vunpack.c.l.bf16 %v194_v29  ;;  %v203_v41 = vunpack.c.l.bf16 %v195_v30 }
  0x4b   :  { %v212_v42 = vrot.slane %v196_v33, 4  ;;  %v213_v43 = vrot.slane %v197_v34, 4  ;;  %v214_v44 = vrot.slane %v198_v36, 4  ;;  %v215_v45 = vrot.slane %v199_v37, 4 }
  0x4c   :  { %v216_v46 = vrot.slane %v200_v38, 4  ;;  %v217_v47 = vrot.slane %v201_v39, 4  ;;  %v218_v48 = vrot.slane %v202_v40, 4  ;;  %v219_v49 = vrot.slane %v203_v41, 4 }
  0x4d   :  { %936 = vmatpush3.bf16.msra.mxu0 %v978_v56  ;;  %956 = vmatpush3.bf16.msra.mxu1 %v978_v56  ;;  %v228_v50 = vadd.f32 %v212_v42, %v180_v21  ;;  %v229_v51 = vadd.f32 %v213_v43, %v181_v22  ;;  %v230_v52 = vadd.f32 %v214_v44, %v182_v25  ;;  %v236_v55 = vrot.slane %v196_v33, 5  ;;  %v260_v56 = vld [vmem:[#allocation2] sm:$0x8] }
  0x4e   :  { %937 = vmatprep.subr.bf16.mxu0 %v1082_v0  ;;  %957 = vmatprep.subr.bf16.mxu1 %v1082_v0  ;;  %v231_v53 = vadd.f32 %v215_v45, %v183_v26  ;;  %v232_v54 = vadd.f32 %v216_v46, %v184_v27  ;;  %v234_v57 = vadd.f32 %v218_v48, %v186_v31  ;;  %v237_v59 = vrot.slane %v197_v34, 5 }
  0x4f   :  { %v235_v58 = vadd.f32 %v219_v49, %v187_v32  ;;  %v238_v62 = vrot.slane %v198_v36, 5  ;;  %v239_v63 = vrot.slane %v199_v37, 5  ;;  %v240_v1 = vrot.slane %v200_v38, 5 }
  0x50   :  { %v242_v4 = vrot.slane %v202_v40, 5  ;;  %v243_v5 = vrot.slane %v203_v41, 5  ;;  %v252_v6 = vadd.f32 %v236_v55, %v228_v50  ;;  %v253_v7 = vadd.f32 %v237_v59, %v229_v51 }
  0x51   :  { %938 = vmatpush3.bf16.msra.mxu0 %v979_v2  ;;  %958 = vmatpush3.bf16.msra.mxu1 %v979_v2  ;;  %v241_v2 = vrot.slane %v201_v39, 5  ;;  %v254_v10 = vadd.f32 %v238_v62, %v230_v52  ;;  %v255_v11 = vadd.f32 %v239_v63, %v231_v53  ;;  %v256_v12 = vadd.f32 %v240_v1, %v232_v54 }
  0x52   :  { %939 = vmatprep.subr.bf16.mxu0 %v1082_v0  ;;  %959 = vmatprep.subr.bf16.mxu1 %v1082_v0  ;;  %v233_v0 = vadd.f32 %v217_v47, %v185_v28  ;;  %v258_v16 = vadd.f32 %v242_v4, %v234_v57  ;;  %v259_v17 = vadd.f32 %v243_v5, %v235_v58  ;;  %v268_v18 = vunpack.c.l.bf16 %v260_v56 }
  0x53   :  { %v269_v19 = vunpack.c.l.bf16 %v261_v60  ;;  %v270_v20 = vunpack.c.l.bf16 %v262_v61  ;;  %v271_v21 = vunpack.c.l.bf16 %v263_v3  ;;  %v272_v22 = vunpack.c.l.bf16 %v264_v8  ;;  %v340_v8 = vld [vmem:[#allocation5] sm:$0x1] }
  0x54   :  { %v257_v13 = vadd.f32 %v241_v2, %v233_v0  ;;  %v273_v23 = vunpack.c.l.bf16 %v265_v9  ;;  %v274_v24 = vunpack.c.l.bf16 %v266_v14  ;;  %v275_v25 = vunpack.c.l.bf16 %v267_v15 }
  0x55   :  { %940 = vmatpush3.bf16.msra.mxu0 %v980_v35  ;;  %960 = vmatpush3.bf16.msra.mxu1 %v980_v35  ;;  %v284_v26 = vrot.slane %v268_v18, 6  ;;  %v285_v27 = vrot.slane %v269_v19, 6  ;;  %v286_v28 = vrot.slane %v270_v20, 6  ;;  %v287_v29 = vrot.slane %v271_v21, 6 }
  0x56   :  { %v288_v30 = vrot.slane %v272_v22, 6  ;;  %v289_v31 = vrot.slane %v273_v23, 6  ;;  %v290_v32 = vrot.slane %v274_v24, 6  ;;  %v291_v33 = vrot.slane %v275_v25, 6 }
  0x57   :  { %v300_v34 = vadd.f32 %v284_v26, %v252_v6  ;;  %v301_v35 = vadd.f32 %v285_v27, %v253_v7  ;;  %v302_v36 = vadd.f32 %v286_v28, %v254_v10  ;;  %v303_v37 = vadd.f32 %v287_v29, %v255_v11 }
  0x58   :  { %v304_v38 = vadd.f32 %v288_v30, %v256_v12  ;;  %v305_v39 = vadd.f32 %v289_v31, %v257_v13  ;;  %v306_v40 = vadd.f32 %v290_v32, %v258_v16  ;;  %v307_v41 = vadd.f32 %v291_v33, %v259_v17  ;;  %v341_v13 = vld [vmem:[#allocation5 + $0x4] sm:$0x1]  ;;  %v347_v31 = vld [vmem:[#allocation5 + $0x1c] sm:$0x1] }
  0x59   :  { %v308_v42 = vrot.slane %v268_v18, 7  ;;  %v309_v43 = vrot.slane %v269_v19, 7  ;;  %v310_v44 = vrot.slane %v270_v20, 7  ;;  %v311_v45 = vrot.slane %v271_v21, 7  ;;  %v342_v18 = vld [vmem:[#allocation5 + $0x8] sm:$0x1] }
  0x5a   :  { %v312_v46 = vrot.slane %v272_v22, 7  ;;  %v313_v47 = vrot.slane %v273_v23, 7  ;;  %v314_v48 = vrot.slane %v274_v24, 7  ;;  %v315_v49 = vrot.slane %v275_v25, 7  ;;  %v343_v19 = vld [vmem:[#allocation5 + $0xc] sm:$0x1] }
  0x5b   :  { %v324_v50 = vadd.f32 %v308_v42, %v300_v34  ;;  %v325_v51 = vadd.f32 %v309_v43, %v301_v35  ;;  %v326_v52 = vadd.f32 %v310_v44, %v302_v36  ;;  %v327_v53 = vadd.f32 %v311_v45, %v303_v37  ;;  %v344_v20 = vld [vmem:[#allocation5 + $0x10] sm:$0x1]  ;;  %v345_v24 = vld [vmem:[#allocation5 + $0x14] sm:$0x1]  ;;  %v346_v25 = vld [vmem:[#allocation5 + $0x18] sm:$0x1] }
  0x5c   :  { %v328_v54 = vadd.f32 %v312_v46, %v304_v38  ;;  %v329_v55 = vadd.f32 %v313_v47, %v305_v39  ;;  %vm674_vm3 = vcmask 1043459   ;;  %v330_v56 = vadd.f32 %v314_v48, %v306_v40  ;;  %v396_v48 = vld [vmem:[#allocation5] sm:$0x2] }
  0x5d   :  { %v331_v0 = vadd.f32 %v315_v49, %v307_v41  ;;  %v332_v57 = vmul.f32 0.125, %v324_v50  ;;  %v333_v58 = vmul.f32 0.125, %v325_v51  ;;  %vm677_vm4 = vcmask 1044484  }
  0x5e   :  { %v334_v59 = vmul.f32 0.125, %v326_v52  ;;  %v335_v60 = vmul.f32 0.125, %v327_v53  ;;  %v336_v61 = vmul.f32 0.125, %v328_v54  ;;  %v337_v62 = vmul.f32 0.125, %v329_v55  ;;  %v397_v53 = vld [vmem:[#allocation5 + $0x4] sm:$0x2] }
  0x5f   :  { %vm680_vm5 = vcmask 1045509   ;;  %v338_v63 = vmul.f32 0.125, %v330_v56  ;;  %v339_v1 = vmul.f32 0.125, %v331_v0  ;;  %v637_v2 = vpack.c.bf16 %v332_v57, %v332_v57  ;;  %v398_v57 = vld [vmem:[#allocation5 + $0x8] sm:$0x2] }
  0x60   :  { %v638_v3 = vpack.c.bf16 %v333_v58, %v333_v58  ;;  %vm683_vm6 = vcmask 1046534   ;;  %v639_v4 = vpack.c.bf16 %v334_v59, %v334_v59  ;;  %v640_v5 = vpack.c.bf16 %v335_v60, %v335_v60  ;;  %v399_v58 = vld [vmem:[#allocation5 + $0xc] sm:$0x2] }
  0x61   :  { %v641_v6 = vpack.c.bf16 %v336_v61, %v336_v61  ;;  %v642_v7 = vpack.c.bf16 %v337_v62, %v337_v62  ;;  %vm686_vm7 = vcmask 1047559   ;;  %v643_v9 = vpack.c.bf16 %v338_v63, %v338_v63  ;;  %v400_v63 = vld [vmem:[#allocation5 + $0x10] sm:$0x2] }
  0x62   :  { %v644_v10 = vpack.c.bf16 %v339_v1, %v339_v1  ;;  %v659_v11 = vunpack.c.l.b16 %v637_v2  ;;  %v660_v12 = vunpack.c.l.b16 %v638_v3  ;;  %v661_v14 = vunpack.c.l.b16 %v639_v4  ;;  %v401_v1 = vld [vmem:[#allocation5 + $0x14] sm:$0x2]  ;;  %v402_v2 = vld [vmem:[#allocation5 + $0x18] sm:$0x2] }
  0x63   :  { %v662_v15 = vunpack.c.l.b16 %v640_v5  ;;  %v663_v16 = vunpack.c.l.b16 %v641_v6  ;;  %v664_v17 = vunpack.c.l.b16 %v642_v7  ;;  %v665_v21 = vunpack.c.l.b16 %v643_v9  ;;  %v403_v7 = vld [vmem:[#allocation5 + $0x1c] sm:$0x2] }
  0x64   :  { %v666_v22 = vunpack.c.l.b16 %v644_v10  ;;  %v667_v23 = vrot.slane %v660_v12, 7  ;;  %v348_v26 = vunpack.c.l.bf16 %v340_v8  ;;  %v670_v27 = vrot.slane %v661_v14, 6 }
  0x65   :  { %v673_v28 = vrot.slane %v662_v15, 5  ;;  %v676_v29 = vrot.slane %v663_v16, 4  ;;  %v679_v30 = vrot.slane %v664_v17, 3  ;;  %v682_v33 = vrot.slane %v665_v21, 2 }
  0x66   :  { %v669_v32 = vsel %vm668_vm1, %v667_v23, %v659_v11  ;;  %v685_v34 = vrot.slane %v666_v22, 1  ;;  %v349_v35 = vunpack.c.l.bf16 %v341_v13  ;;  %v350_v37 = vunpack.c.l.bf16 %v342_v18 }
  0x67   :  { %v672_v36 = vsel %vm671_vm2, %v670_v27, %v669_v32  ;;  %v351_v38 = vunpack.c.l.bf16 %v343_v19  ;;  %v352_v39 = vunpack.c.l.bf16 %v344_v20  ;;  %v353_v41 = vunpack.c.l.bf16 %v345_v24  ;;  %v468_v32 = vld [vmem:[#allocation5] sm:$0x4] }
  0x68   :  { %v675_v40 = vsel %vm674_vm3, %v673_v28, %v672_v36  ;;  %v354_v42 = vunpack.c.l.bf16 %v346_v25  ;;  %v355_v43 = vunpack.c.l.bf16 %v347_v31  ;;  %v372_v45 = vrot.slane %v348_v26, 1 }
  0x69   :  { %v678_v44 = vsel %vm677_vm4, %v676_v29, %v675_v40  ;;  %v373_v46 = vrot.slane %v349_v35, 1  ;;  %v374_v47 = vrot.slane %v350_v37, 1  ;;  %v375_v50 = vrot.slane %v351_v38, 1 }
  0x6a   :  { %v681_v49 = vsel %vm680_vm5, %v679_v30, %v678_v44  ;;  %v376_v51 = vrot.slane %v352_v39, 1  ;;  %v377_v52 = vrot.slane %v353_v41, 1  ;;  %v378_v55 = vrot.slane %v354_v42, 1  ;;  %v472_v44 = vld [vmem:[#allocation5 + $0x10] sm:$0x4] }
  0x6b   :  { %v684_v54 = vsel %vm683_vm6, %v682_v33, %v681_v49  ;;  %v379_v56 = vrot.slane %v355_v43, 1  ;;  %v388_v0 = vadd.f32 %v372_v45, %v348_v26  ;;  %v389_v60 = vadd.f32 %v373_v46, %v349_v35  ;;  %v469_v33 = vld [vmem:[#allocation5 + $0x4] sm:$0x4]  ;;  %v473_v49 = vld [vmem:[#allocation5 + $0x14] sm:$0x4] }
  0x6c   :  { %v687_v59 = vsel %vm686_vm7, %v685_v34, %v684_v54  ;;  %v390_v61 = vadd.f32 %v374_v47, %v350_v37  ;;  %v391_v62 = vadd.f32 %v375_v50, %v351_v38  ;;  %v392_v4 = vadd.f32 %v376_v51, %v352_v39  ;;  %v470_v34 = vld [vmem:[#allocation5 + $0x8] sm:$0x4]  ;;  %v471_v39 = vld [vmem:[#allocation5 + $0xc] sm:$0x4]  ;;  %v474_v50 = vld [vmem:[#allocation5 + $0x18] sm:$0x4] }
  0x6d   :  { %v688_v3 = vpack.c.b16 %v687_v59, %v687_v59  ;;  %v393_v5 = vadd.f32 %v377_v52, %v353_v41  ;;  %v394_v6 = vadd.f32 %v378_v55, %v354_v42  ;;  %v395_v8 = vadd.f32 %v379_v56, %v355_v43  ;;  %v475_v55 = vld [vmem:[#allocation5 + $0x1c] sm:$0x4] }
  0x6e   :  { %v404_v9 = vunpack.c.l.bf16 %v396_v48  ;;  %v405_v10 = vunpack.c.l.bf16 %v397_v53  ;;  %v406_v11 = vunpack.c.l.bf16 %v398_v57  ;;  %v407_v12 = vunpack.c.l.bf16 %v399_v58 }
  0x6f   :  { %942 = vmatmul.mubr.bf16.vlgmr.msra.gmra.mrb[0].mxu0 %v688_v3  ;;  %v408_v13 = vunpack.c.l.bf16 %v400_v63  ;;  %v409_v14 = vunpack.c.l.bf16 %v401_v1  ;;  %v410_v15 = vunpack.c.l.bf16 %v402_v2  ;;  %v411_v16 = vunpack.c.l.bf16 %v403_v7 }
  0x70   :  { %v420_v17 = vrot.slane %v404_v9, 2  ;;  %v421_v18 = vrot.slane %v405_v10, 2  ;;  %v422_v19 = vrot.slane %v406_v11, 2  ;;  %v423_v20 = vrot.slane %v407_v12, 2 }
  0x71   :  { %v424_v21 = vrot.slane %v408_v13, 2  ;;  %v425_v22 = vrot.slane %v409_v14, 2  ;;  %v426_v23 = vrot.slane %v410_v15, 2  ;;  %v427_v24 = vrot.slane %v411_v16, 2 }
  0x72   :  { %v436_v25 = vadd.f32 %v420_v17, %v388_v0  ;;  %v437_v26 = vadd.f32 %v421_v18, %v389_v60  ;;  %v438_v27 = vadd.f32 %v422_v19, %v390_v61  ;;  %v439_v28 = vadd.f32 %v423_v20, %v391_v62  ;;  %v541_v17 = vld [vmem:[#allocation5 + $0x4] sm:$0x8]  ;;  %v542_v18 = vld [vmem:[#allocation5 + $0x8] sm:$0x8] }
  0x73   :  { %v440_v29 = vadd.f32 %v424_v21, %v392_v4  ;;  %v441_v30 = vadd.f32 %v425_v22, %v393_v5  ;;  %v442_v31 = vadd.f32 %v426_v23, %v394_v6  ;;  %v443_v35 = vadd.f32 %v427_v24, %v395_v8  ;;  %v543_v23 = vld [vmem:[#allocation5 + $0xc] sm:$0x8] }
  0x74   :  { %v444_v36 = vrot.slane %v404_v9, 3  ;;  %v445_v37 = vrot.slane %v405_v10, 3  ;;  %v446_v38 = vrot.slane %v406_v11, 3  ;;  %v447_v40 = vrot.slane %v407_v12, 3 }
  0x75   :  { %v448_v41 = vrot.slane %v408_v13, 3  ;;  %v449_v42 = vrot.slane %v409_v14, 3  ;;  %v450_v43 = vrot.slane %v410_v15, 3  ;;  %v451_v45 = vrot.slane %v411_v16, 3  ;;  %v540_v16 = vld [vmem:[#allocation5] sm:$0x8] }
  0x76   :  { %v460_v46 = vadd.f32 %v444_v36, %v436_v25  ;;  %v461_v47 = vadd.f32 %v445_v37, %v437_v26  ;;  %v462_v48 = vadd.f32 %v446_v38, %v438_v27  ;;  %v463_v51 = vadd.f32 %v447_v40, %v439_v28  ;;  %v544_v28 = vld [vmem:[#allocation5 + $0x10] sm:$0x8] }
  0x77   :  { %v464_v52 = vadd.f32 %v448_v41, %v440_v29  ;;  %v465_v53 = vadd.f32 %v449_v42, %v441_v30  ;;  %v466_v54 = vadd.f32 %v450_v43, %v442_v31  ;;  %v467_v56 = vadd.f32 %v451_v45, %v443_v35 }
  0x78   :  { %v476_v0 = vunpack.c.l.bf16 %v468_v32  ;;  %v477_v57 = vunpack.c.l.bf16 %v469_v33  ;;  %v478_v58 = vunpack.c.l.bf16 %v470_v34  ;;  %v479_v59 = vunpack.c.l.bf16 %v471_v39  ;;  %v545_v33 = vld [vmem:[#allocation5 + $0x14] sm:$0x8]  ;;  %v546_v34 = vld [vmem:[#allocation5 + $0x18] sm:$0x8]  ;;  %v547_v39 = vld [vmem:[#allocation5 + $0x1c] sm:$0x8] }
  0x79   :  { %v480_v60 = vunpack.c.l.bf16 %v472_v44  ;;  %v481_v61 = vunpack.c.l.bf16 %v473_v49  ;;  %v482_v62 = vunpack.c.l.bf16 %v474_v50  ;;  %v483_v63 = vunpack.c.l.bf16 %v475_v55 }
  0x7a   :  { %v492_v1 = vrot.slane %v476_v0, 4  ;;  %v493_v2 = vrot.slane %v477_v57, 4  ;;  %v494_v3 = vrot.slane %v478_v58, 4  ;;  %v495_v4 = vrot.slane %v479_v59, 4 }
  0x7b   :  { %v496_v5 = vrot.slane %v480_v60, 4  ;;  %v497_v6 = vrot.slane %v481_v61, 4  ;;  %v498_v7 = vrot.slane %v482_v62, 4  ;;  %v499_v8 = vrot.slane %v483_v63, 4 }
  0x7c   :  { %v508_v9 = vadd.f32 %v492_v1, %v460_v46  ;;  %v509_v10 = vadd.f32 %v493_v2, %v461_v47  ;;  %v510_v11 = vadd.f32 %v494_v3, %v462_v48  ;;  %v511_v12 = vadd.f32 %v495_v4, %v463_v51 }
  0x7d   :  { %v512_v13 = vadd.f32 %v496_v5, %v464_v52  ;;  %v513_v14 = vadd.f32 %v497_v6, %v465_v53  ;;  %v514_v15 = vadd.f32 %v498_v7, %v466_v54  ;;  %v515_v19 = vadd.f32 %v499_v8, %v467_v56 }
  0x7e   :  { %v516_v20 = vrot.slane %v476_v0, 5  ;;  %v517_v21 = vrot.slane %v477_v57, 5  ;;  %v518_v22 = vrot.slane %v478_v58, 5  ;;  %v519_v24 = vrot.slane %v479_v59, 5 }
  0x7f   :  { %v520_v25 = vrot.slane %v480_v60, 5  ;;  %v521_v26 = vrot.slane %v481_v61, 5  ;;  %v522_v27 = vrot.slane %v482_v62, 5  ;;  %v523_v29 = vrot.slane %v483_v63, 5 }
  0x80   :  { %v532_v30 = vadd.f32 %v516_v20, %v508_v9  ;;  %v533_v31 = vadd.f32 %v517_v21, %v509_v10  ;;  %v534_v32 = vadd.f32 %v518_v22, %v510_v11  ;;  %v535_v35 = vadd.f32 %v519_v24, %v511_v12 }
  0x81   :  { %v536_v36 = vadd.f32 %v520_v25, %v512_v13  ;;  %v537_v37 = vadd.f32 %v521_v26, %v513_v14  ;;  %v538_v38 = vadd.f32 %v522_v27, %v514_v15  ;;  %v539_v40 = vadd.f32 %v523_v29, %v515_v19 }
  0x82   :  { %v548_v41 = vunpack.c.l.bf16 %v540_v16  ;;  %v549_v42 = vunpack.c.l.bf16 %v541_v17  ;;  %v550_v43 = vunpack.c.l.bf16 %v542_v18  ;;  %v551_v44 = vunpack.c.l.bf16 %v543_v23 }
  0x83   :  { %v552_v45 = vunpack.c.l.bf16 %v544_v28  ;;  %v553_v46 = vunpack.c.l.bf16 %v545_v33  ;;  %v554_v47 = vunpack.c.l.bf16 %v546_v34  ;;  %v555_v48 = vunpack.c.l.bf16 %v547_v39 }
  0x84   :  { %v564_v49 = vrot.slane %v548_v41, 6  ;;  %v565_v50 = vrot.slane %v549_v42, 6  ;;  %v566_v51 = vrot.slane %v550_v43, 6  ;;  %v567_v52 = vrot.slane %v551_v44, 6 }
  0x85   :  { %v568_v53 = vrot.slane %v552_v45, 6  ;;  %v569_v54 = vrot.slane %v553_v46, 6  ;;  %v570_v55 = vrot.slane %v554_v47, 6  ;;  %v571_v56 = vrot.slane %v555_v48, 6 }
  0x86   :  { %v580_v0 = vadd.f32 %v564_v49, %v532_v30  ;;  %v581_v57 = vadd.f32 %v565_v50, %v533_v31  ;;  %v582_v58 = vadd.f32 %v566_v51, %v534_v32  ;;  %v583_v59 = vadd.f32 %v567_v52, %v535_v35 }
  0x87   :  { %v584_v60 = vadd.f32 %v568_v53, %v536_v36  ;;  %v585_v61 = vadd.f32 %v569_v54, %v537_v37  ;;  %v586_v62 = vadd.f32 %v570_v55, %v538_v38  ;;  %v587_v63 = vadd.f32 %v571_v56, %v539_v40  ;;  %v898_v56 = vld [vmem:[%s1215_s3] ss:$0 sm:$0xff]  ;;  %s1084_s3 = smov [#allocation8]  }
  0x88   :  { %v588_v1 = vrot.slane %v548_v41, 7  ;;  %v589_v2 = vrot.slane %v549_v42, 7  ;;  %v590_v3 = vrot.slane %v550_v43, 7  ;;  %v591_v4 = vrot.slane %v551_v44, 7  ;;  %s888_s26 = sshll.u32 %s1084_s3, 4  ;;  %s889_s26 = int_to_ptr.vmem [resolvable:$true] %s888_s26 }
  0x89   :  { %v592_v5 = vrot.slane %v552_v45, 7  ;;  %v593_v6 = vrot.slane %v553_v46, 7  ;;  %v594_v7 = vrot.slane %v554_v47, 7  ;;  %v595_v8 = vrot.slane %v555_v48, 7  ;;  %s1049_s27 = scalar_lea.vmem %s889_s26, 16  ;;  %s1053_s28 = scalar_lea.vmem %s889_s26, 32 }
  0x8a   :  { %v604_v9 = vadd.f32 %v588_v1, %v580_v0  ;;  %v605_v10 = vadd.f32 %v589_v2, %v581_v57  ;;  %v606_v11 = vadd.f32 %v590_v3, %v582_v58  ;;  %v607_v12 = vadd.f32 %v591_v4, %v583_v59  ;;  %p1050_p10 = scmp.ne.s32.totalorder %s889_s26, %s1049_s27  ;;  %p1054_p11 = scmp.lt.s32.totalorder %s889_s26, %s889_s26 }
  0x8b   :  { %v608_v13 = vadd.f32 %v592_v5, %v584_v60  ;;  %v609_v14 = vadd.f32 %v593_v6, %v585_v61  ;;  %v610_v15 = vadd.f32 %v594_v7, %v586_v62  ;;  %v611_v16 = vadd.f32 %v595_v8, %v587_v63  ;;  %p1055_p12 = scmp.lt.s32.totalorder %s1053_s28, %s1049_s27 }
  0x8c   :  { %v612_v17 = vmul.f32 0.125, %v604_v9  ;;  %v613_v18 = vmul.f32 0.125, %v605_v10  ;;  %v614_v19 = vmul.f32 0.125, %v606_v11  ;;  %v615_v20 = vmul.f32 0.125, %v607_v12 }
  0x8d   :  { %v616_v21 = vmul.f32 0.125, %v608_v13  ;;  %v617_v22 = vmul.f32 0.125, %v609_v14  ;;  %v618_v23 = vmul.f32 0.125, %v610_v15  ;;  %v619_v24 = vmul.f32 0.125, %v611_v16  ;;  %p1056_p13 = por %p1055_p12, %p1054_p11 }
  0x8e   :  { %v778_v25 = vpack.c.bf16 %v612_v17, %v612_v17  ;;  %v779_v26 = vpack.c.bf16 %v613_v18, %v613_v18  ;;  %v780_v27 = vpack.c.bf16 %v614_v19, %v614_v19  ;;  %v781_v28 = vpack.c.bf16 %v615_v20, %v615_v20 }
  0x8f   :  { %v782_v29 = vpack.c.bf16 %v616_v21, %v616_v21  ;;  %v783_v30 = vpack.c.bf16 %v617_v22, %v617_v22  ;;  %v784_v31 = vpack.c.bf16 %v618_v23, %v618_v23  ;;  %v785_v32 = vpack.c.bf16 %v619_v24, %v619_v24  ;;  %p1057_p0 = pnand %p1056_p13, %p1050_p10 }
  0x90   :  { %v794_v33 = vunpack.c.l.b16 %v778_v25  ;;  %v795_v34 = vunpack.c.l.b16 %v779_v26  ;;  %v796_v35 = vunpack.c.l.b16 %v780_v27  ;;  %v797_v36 = vunpack.c.l.b16 %v781_v28 }
  0x91   :  { %v798_v37 = vunpack.c.l.b16 %v782_v29  ;;  %v799_v38 = vunpack.c.l.b16 %v783_v30  ;;  %v800_v39 = vunpack.c.l.b16 %v784_v31  ;;  %v801_v40 = vunpack.c.l.b16 %v785_v32 }
  0x92   :  { %v802_v41 = vrot.slane %v795_v34, 7  ;;  %v804_v42 = vrot.slane %v796_v35, 6  ;;  %v806_v43 = vrot.slane %v797_v36, 5  ;;  %v873_v10 = vlaneseq }
  0x93   :  { %v808_v44 = vrot.slane %v798_v37, 4  ;;  %v810_v46 = vrot.slane %v799_v38, 3  ;;  %v812_v48 = vrot.slane %v800_v39, 2  ;;  %v814_v50 = vrot.slane %v801_v40, 1 }
  0x94   :  { %v803_v45 = vsel %vm668_vm1, %v802_v41, %v794_v33  ;;  %v874_v11 = vand.u32 127, %v873_v10  ;;  %v876_v12 = vshrl.u32 %v873_v10, 7  ;;  %vm880_vm8 = vcmask 57344  }
  0x95   :  { %v805_v47 = vsel %vm671_vm2, %v804_v42, %v803_v45 }
  0x96   :  { %v807_v49 = vsel %vm674_vm3, %v806_v43, %v805_v47  ;;  %v877_v16 = vsub.s32 %v874_v11, %v876_v12 }
  0x97   :  { %v809_v51 = vsel %vm677_vm4, %v808_v44, %v807_v49 }
  0x98   :  { %v811_v52 = vsel %vm680_vm5, %v810_v46, %v809_v51 }
  0x99   :  { %v813_v53 = vsel %vm683_vm6, %v812_v48, %v811_v52 }
  0x9a   :  { %v815_v54 = vsel %vm686_vm7, %v814_v50, %v813_v53 }
  0x9b   :  { %v816_v55 = vpack.c.b16 %v815_v54, %v815_v54 }
  0x9d   :  { %962 = vmatmul.mubr.bf16.vlgmr.msra.gmra.mrb[0].mxu1 %v816_v55 }
 0x142   :  { %v772_v0 = vpop.f32.mrb[0].mxu0 }
 0x143   :  { %v773_v57 = vadd.f32 %v898_v56, %v772_v0  ;;  %v943_v58 = vpop.f32.mrb[1].mxu0 }
 0x144   :  { %v775_v59 = vpop.f32.mrb[2].mxu0 }
 0x145   :  { %v944_v60 = vpop.f32.mrb[3].mxu0  ;;  %v861_v61 = vmul.f32 %v773_v57, %v773_v57 }
 0x147   :  { %862 = vadd.xlane.f32.xlu0 %v861_v61 }
 0x170   :  { %v852_v62 = vpop.f32.mrb[0].mxu1 }
 0x171   :  { %v853_v63 = vadd.f32 %v898_v56, %v852_v62  ;;  %v963_v1 = vpop.f32.mrb[1].mxu1 }
 0x172   :  { %v855_v2 = vpop.f32.mrb[2].mxu1 }
 0x173   :  { %v964_v3 = vpop.f32.mrb[3].mxu1  ;;  %v858_v4 = vmul.f32 %v853_v63, %v773_v57  ;;  %v864_v5 = vmul.f32 %v853_v63, %v853_v63 }
 0x175   :  { %859 = vadd.xlane.f32.xlu1 %v858_v4  ;;  %865 = vadd.xlane.f32.xlu0 %v864_v5 }
 0x1d4   :  { %v863_v6 = vpop.xlane.xlu0 %862 }
 0x202   :  { %v866_v7 = vpop.xlane.xlu0 %865  ;;  %v860_v14 = vpop.xlane.xlu1 %859 }
 0x203   :  { %v867_v8 = vmul.f32 %v866_v7, %v863_v6 }
 0x205   :  { %v868_v9 = vmax.f32 %v867_v8, 1e-16 }
 0x207   :  { %981 = vrsqrt.f32 %v868_v9 }
 0x211   :  { %v982_v13 = vpop.eup %981 }
 0x212   :  { %v870_v15 = vmul.f32 %v982_v13, %v860_v14 }
 0x214   :  { %v871_v17 = vsub.f32 1.0, %v870_v15 }
 0x216   :  { %v878_v18 = vrot.slane %v871_v17, %v877_v16 }
 0x218   :  { %881 = vst.msk [vmem:[#allocation8] sm:$0x1] %vm880_vm8, %v878_v18 }
 0x219   :  { %1060 = shalt.err (!%p1057_p0)
}
 0x21a   :  { %s1061_s5 = scalar_lea.hbm %s1216_s4, 16 }
 0x21b   :  { %p1062_p1 = scmp.ne.s32.totalorder %s1216_s4, %s1061_s5  ;;  %p1065_p2 = scmp.lt.u32.totalorder %s1061_s5, %s1216_s4 }
 0x21d   :  { %p1067_p3 = pnand %p1065_p2, %p1062_p1 }
 0x21f   :  { %1070 = shalt.err (!%p1067_p3)
}
 0x220   :  { %891 = dma.vmem_to_hbm [thread:$0]  %s889_s26, 16, %s1216_s4, [#allocation4]  }
 0x221   :  { %1075 = dma.done.wait [#allocation4], 16  }
 0x222   :  { %1076 = vsyncadd [#allocation4], 4294967280 }
 0x223   :  { %895 = vsyncpa [#allocation3], 1 }
 0x224   :  { %896 = vsyncpa [#allocation6], 1 }
 0x225   :  { %897 = vsyncpa [#allocation4], 1 }

</bundles_post_ra>
